<compile_context>
chip_gen: v5e
topology: v5e:2x2
jax: 0.10.0
libtpu: 0.0.40
codegen_flags: <defaults>
</compile_context>

<pallas_src>
import functools
from itertools import combinations_with_replacement

import jax
import jax.numpy as jnp
import numpy as np
from jax.experimental import pallas as pl
from jax.experimental.pallas import tpu as pltpu

_SUB = 8                  # sublanes per f32 vreg
_LANE = 128               # lanes per vreg
_CHUNK = _SUB * _LANE     # batch elements per fully-unrolled inner chunk (one vreg)


def _feature_count(max_degree, input_dim):
    return 1 + sum(
        len(list(combinations_with_replacement(range(input_dim), d)))
        for d in range(1, max_degree + 1))


def _feature_degrees(max_degree, input_dim):
    """Per-feature polynomial degree in the exact PyTorch transform_x order."""
    degs = [0]
    for d in range(1, max_degree + 1):
        degs.extend([d] * len(list(combinations_with_replacement(range(input_dim), d))))
    return np.asarray(degs, np.float32)


def _poly_logreg_kernel(x_ref, w_ref, o_ref, *, input_dim, max_degree, tile_rows):
    """Hot path, batch = (rows x 128 lanes).
    x_ref: (D, tile_rows, 128) inputs, w_ref: (P,) SMEM per-feature weights
    (bias folded into w_ref[0]), o_ref: (tile_rows, 128) probabilities."""
    D = input_dim
    # Process the tile in (8, 128) one-vreg chunks with static slices: every
    # intermediate (x rows, prefix products, accumulator) stays register
    # resident; the only VMEM traffic is the x loads and one output store.
    for r0 in range(0, tile_rows, _SUB):
        xs = [x_ref[i, r0:r0 + _SUB, :] for i in range(D)]     # D loads, 1 vreg each
        # Constant feature (==1) carries the bias-folded weight: seeds the acc.
        acc = jnp.full((_SUB, _LANE), w_ref[0], dtype=jnp.float32)
        j = 1
        # Degree-1 features are the raw inputs.
        prods = {}
        for i in range(D):
            prods[(i,)] = xs[i]
            acc = acc + w_ref[j] * xs[i]
            j += 1
        # Degree d >= 2: extend the previous degree's prefix product by one
        # factor (1 extra multiply per feature instead of d-1).
        for d in range(2, max_degree + 1):
            nxt = {}
            for c in combinations_with_replacement(range(D), d):
                p = prods[c[:-1]] * xs[c[-1]]
                nxt[c] = p
                acc = acc + w_ref[j] * p
                j += 1
            prods = nxt
        o_ref[r0:r0 + _SUB, :] = jax.nn.sigmoid(acc)            # EUP slot, lane-dense store


def _round_up(n, m):
    return (n + m - 1) // m * m


def logistic_regression_forward(x, m_raw, lin_w, lin_b, *,
                                max_degree, input_dim, tile_b=None):
    assert max_degree >= 1 and input_dim >= 1, "degenerate polynomial config"
    B, D = x.shape
    assert D == input_dim
    P = _feature_count(max_degree, input_dim)

    # Adaptive per-degree soft weighting folded into the linear weights; bias is
    # folded into the constant feature's weight -> single (P,) SMEM vector.
    M = jax.nn.sigmoid(jnp.asarray(m_raw, jnp.float32)) * (max_degree - 1) + 1.0
    degs = jnp.asarray(_feature_degrees(max_degree, input_dim))            # (P,)
    deg_w = jnp.where(degs == 0.0, jnp.float32(1.0),
                      jax.nn.sigmoid(10.0 * (M - degs + 0.5)))
    w_eff = lin_w.reshape(P).astype(jnp.float32) * deg_w
    w_eff = w_eff.at[0].add(jnp.asarray(lin_b, jnp.float32).reshape(()))   # fold bias

    # Batch tiling: batch -> (rows, 128 lanes); tile_b elements per grid step.
    if tile_b is None:
        tile_b = min(32768, _round_up(B, _CHUNK))
        # Prefer >= 2 grid steps when the batch allows it (v7x has 2 TensorCores).
        if B > 2 * _CHUNK and _round_up(B, tile_b) // tile_b < 2:
            tile_b = _round_up((B + 1) // 2, _CHUNK)
    tile_b = _round_up(tile_b, _CHUNK)
    B_pad = _round_up(B, tile_b)
    tile_rows = tile_b // _LANE
    n_rows = B_pad // _LANE

    # (B, D) -> (D, n_rows, 128): single fused cast+pad+transpose producer.
    # TODO(synk): accept x pre-transposed as (D, B) to skip this HBM pass for huge B.
    x_t = jnp.pad(x.astype(jnp.float32),
                  ((0, B_pad - B), (0, 0))).T.reshape(D, n_rows, _LANE)

    kernel = functools.partial(_poly_logreg_kernel, input_dim=D,
                               max_degree=max_degree, tile_rows=tile_rows)
    out = pl.pallas_call(
        kernel,
        out_shape=jax.ShapeDtypeStruct((n_rows, _LANE), jnp.float32),
        grid=(B_pad // tile_b,),
        in_specs=[
            pl.BlockSpec((D, tile_rows, _LANE), lambda i: (0, i, 0)),      # batch-tiled x
            pl.BlockSpec(memory_space=pltpu.MemorySpace.SMEM),             # (P,) weights
        ],
        out_specs=pl.BlockSpec((tile_rows, _LANE), lambda i: (i, 0)),      # lane-dense out
        compiler_params=pltpu.CompilerParams(
            dimension_semantics=("parallel",)),                            # megacore on v7x
    )(x_t, w_eff)

    return out.reshape(B_pad)[:B].reshape(B, 1)                            # drop padded tail


def _reference_forward(x, m_raw, lin_w, lin_b, *, max_degree, input_dim):
    """Pure-JAX transliteration of the PyTorch forward, for verification."""
    M = jax.nn.sigmoid(jnp.asarray(m_raw, jnp.float32)) * (max_degree - 1) + 1.0
    feats = [jnp.ones((x.shape[0], 1), jnp.float32)]
    for d in range(1, max_degree + 1):
        wgt = jax.nn.sigmoid(10.0 * (M - d + 0.5))
        for c in combinations_with_replacement(range(input_dim), d):
            prod = jnp.prod(x[:, list(c)], axis=1, keepdims=True)
            feats.append(prod * wgt)
    xt = jnp.concatenate(feats, axis=1)
    return jax.nn.sigmoid(xt @ lin_w.reshape(-1, 1) + lin_b.reshape(1, 1))


if __name__ == "__main__":
    max_degree, input_dim, batch = 3, 4, 8
    P = _feature_count(max_degree, input_dim)          # 1 + 4 + 10 + 20 = 35

    key = jax.random.PRNGKey(0)
    kx, kw, kb, kx2 = jax.random.split(key, 4)
    x = jax.random.normal(kx, (batch, input_dim), jnp.float32)

    # deterministic params (nn.Linear init is U(-1/sqrt(P), 1/sqrt(P)); M_raw init 0.0)
    bound = 1.0 / float(np.sqrt(P))
    lin_w = jax.random.uniform(kw, (1, P), jnp.float32, -bound, bound)
    lin_b = jax.random.uniform(kb, (1,), jnp.float32, -bound, bound)
    m_raw = jnp.float32(0.0)

    # small case (single grid step, single inner chunk, padded tail)
    out = logistic_regression_forward(
        x, m_raw, lin_w, lin_b, max_degree=max_degree, input_dim=input_dim)
    out = jax.block_until_ready(out)
    ref = _reference_forward(
        x, m_raw, lin_w, lin_b, max_degree=max_degree, input_dim=input_dim)
    assert out.shape == (batch, 1) and out.dtype == jnp.float32
    np.testing.assert_allclose(np.asarray(out), np.asarray(ref), rtol=1e-5, atol=1e-5)

    # larger case: 3 grid steps, 2 inner sublane chunks per step, padded tail
    batch2 = 5000
    x2 = jax.random.normal(kx2, (batch2, input_dim), jnp.float32)
    out2 = logistic_regression_forward(
        x2, m_raw, lin_w, lin_b,
        max_degree=max_degree, input_dim=input_dim, tile_b=2048)
    out2 = jax.block_until_ready(out2)
    ref2 = _reference_forward(
        x2, m_raw, lin_w, lin_b, max_degree=max_degree, input_dim=input_dim)
    np.testing.assert_allclose(np.asarray(out2), np.asarray(ref2), rtol=1e-5, atol=1e-5)

    print("KERNEL_OK")
</pallas_src>

<mosaic_0001>
module attributes {stable_mosaic.version = 11 : i64} {
  func.func @_poly_logreg_kernel(%arg0: i32, %arg1: memref<4x8x128xf32, #tpu.memory_space<vmem>>, %arg2: memref<35xf32, #tpu.memory_space<smem>>, %arg3: memref<8x128xf32, #tpu.memory_space<vmem>>) attributes {dimension_semantics = [#tpu.dimension_semantics<parallel>], iteration_bounds = array<i64: 1>, scalar_prefetch = 0 : i64, scratch_operands = 0 : i64, tpu.core_type = #tpu.core_type<tc>, window_params = [{transform_indices = @transform_0, window_bounds = array<i64: 4, 8, 128>}, {transform_indices = @transform_1, window_bounds = array<i64: 35>}, {transform_indices = @transform_2, window_bounds = array<i64: 8, 128>}]} {
    %c0 = arith.constant 0 : index
    %c0_0 = arith.constant 0 : index
    %c0_1 = arith.constant 0 : index
    %0 = vector.load %arg1[%c0, %c0_0, %c0_1] : memref<4x8x128xf32, #tpu.memory_space<vmem>>, vector<1x8x128xf32>
    %1 = vector.shape_cast %0 : vector<1x8x128xf32> to vector<8x128xf32>
    %c1 = arith.constant 1 : index
    %c0_2 = arith.constant 0 : index
    %c0_3 = arith.constant 0 : index
    %2 = vector.load %arg1[%c1, %c0_2, %c0_3] : memref<4x8x128xf32, #tpu.memory_space<vmem>>, vector<1x8x128xf32>
    %3 = vector.shape_cast %2 : vector<1x8x128xf32> to vector<8x128xf32>
    %c2 = arith.constant 2 : index
    %c0_4 = arith.constant 0 : index
    %c0_5 = arith.constant 0 : index
    %4 = vector.load %arg1[%c2, %c0_4, %c0_5] : memref<4x8x128xf32, #tpu.memory_space<vmem>>, vector<1x8x128xf32>
    %5 = vector.shape_cast %4 : vector<1x8x128xf32> to vector<8x128xf32>
    %c3 = arith.constant 3 : index
    %c0_6 = arith.constant 0 : index
    %c0_7 = arith.constant 0 : index
    %6 = vector.load %arg1[%c3, %c0_6, %c0_7] : memref<4x8x128xf32, #tpu.memory_space<vmem>>, vector<1x8x128xf32>
    %7 = vector.shape_cast %6 : vector<1x8x128xf32> to vector<8x128xf32>
    %c0_8 = arith.constant 0 : index
    %8 = memref.load %arg2[%c0_8] : memref<35xf32, #tpu.memory_space<smem>>
    %9 = vector.broadcast %8 : f32 to vector<8x128xf32>
    %c1_9 = arith.constant 1 : index
    %10 = memref.load %arg2[%c1_9] : memref<35xf32, #tpu.memory_space<smem>>
    %11 = vector.broadcast %10 : f32 to vector<8x128xf32>
    %12 = arith.mulf %11, %1 : vector<8x128xf32>
    %13 = arith.addf %9, %12 : vector<8x128xf32>
    %c2_10 = arith.constant 2 : index
    %14 = memref.load %arg2[%c2_10] : memref<35xf32, #tpu.memory_space<smem>>
    %15 = vector.broadcast %14 : f32 to vector<8x128xf32>
    %16 = arith.mulf %15, %3 : vector<8x128xf32>
    %17 = arith.addf %13, %16 : vector<8x128xf32>
    %c3_11 = arith.constant 3 : index
    %18 = memref.load %arg2[%c3_11] : memref<35xf32, #tpu.memory_space<smem>>
    %19 = vector.broadcast %18 : f32 to vector<8x128xf32>
    %20 = arith.mulf %19, %5 : vector<8x128xf32>
    %21 = arith.addf %17, %20 : vector<8x128xf32>
    %c4 = arith.constant 4 : index
    %22 = memref.load %arg2[%c4] : memref<35xf32, #tpu.memory_space<smem>>
    %23 = vector.broadcast %22 : f32 to vector<8x128xf32>
    %24 = arith.mulf %23, %7 : vector<8x128xf32>
    %25 = arith.addf %21, %24 : vector<8x128xf32>
    %26 = arith.mulf %1, %1 : vector<8x128xf32>
    %c5 = arith.constant 5 : index
    %27 = memref.load %arg2[%c5] : memref<35xf32, #tpu.memory_space<smem>>
    %28 = vector.broadcast %27 : f32 to vector<8x128xf32>
    %29 = arith.mulf %28, %26 : vector<8x128xf32>
    %30 = arith.addf %25, %29 : vector<8x128xf32>
    %31 = arith.mulf %1, %3 : vector<8x128xf32>
    %c6 = arith.constant 6 : index
    %32 = memref.load %arg2[%c6] : memref<35xf32, #tpu.memory_space<smem>>
    %33 = vector.broadcast %32 : f32 to vector<8x128xf32>
    %34 = arith.mulf %33, %31 : vector<8x128xf32>
    %35 = arith.addf %30, %34 : vector<8x128xf32>
    %36 = arith.mulf %1, %5 : vector<8x128xf32>
    %c7 = arith.constant 7 : index
    %37 = memref.load %arg2[%c7] : memref<35xf32, #tpu.memory_space<smem>>
    %38 = vector.broadcast %37 : f32 to vector<8x128xf32>
    %39 = arith.mulf %38, %36 : vector<8x128xf32>
    %40 = arith.addf %35, %39 : vector<8x128xf32>
    %41 = arith.mulf %1, %7 : vector<8x128xf32>
    %c8 = arith.constant 8 : index
    %42 = memref.load %arg2[%c8] : memref<35xf32, #tpu.memory_space<smem>>
    %43 = vector.broadcast %42 : f32 to vector<8x128xf32>
    %44 = arith.mulf %43, %41 : vector<8x128xf32>
    %45 = arith.addf %40, %44 : vector<8x128xf32>
    %46 = arith.mulf %3, %3 : vector<8x128xf32>
    %c9 = arith.constant 9 : index
    %47 = memref.load %arg2[%c9] : memref<35xf32, #tpu.memory_space<smem>>
    %48 = vector.broadcast %47 : f32 to vector<8x128xf32>
    %49 = arith.mulf %48, %46 : vector<8x128xf32>
    %50 = arith.addf %45, %49 : vector<8x128xf32>
    %51 = arith.mulf %3, %5 : vector<8x128xf32>
    %c10 = arith.constant 10 : index
    %52 = memref.load %arg2[%c10] : memref<35xf32, #tpu.memory_space<smem>>
    %53 = vector.broadcast %52 : f32 to vector<8x128xf32>
    %54 = arith.mulf %53, %51 : vector<8x128xf32>
    %55 = arith.addf %50, %54 : vector<8x128xf32>
    %56 = arith.mulf %3, %7 : vector<8x128xf32>
    %c11 = arith.constant 11 : index
    %57 = memref.load %arg2[%c11] : memref<35xf32, #tpu.memory_space<smem>>
    %58 = vector.broadcast %57 : f32 to vector<8x128xf32>
    %59 = arith.mulf %58, %56 : vector<8x128xf32>
    %60 = arith.addf %55, %59 : vector<8x128xf32>
    %61 = arith.mulf %5, %5 : vector<8x128xf32>
    %c12 = arith.constant 12 : index
    %62 = memref.load %arg2[%c12] : memref<35xf32, #tpu.memory_space<smem>>
    %63 = vector.broadcast %62 : f32 to vector<8x128xf32>
    %64 = arith.mulf %63, %61 : vector<8x128xf32>
    %65 = arith.addf %60, %64 : vector<8x128xf32>
    %66 = arith.mulf %5, %7 : vector<8x128xf32>
    %c13 = arith.constant 13 : index
    %67 = memref.load %arg2[%c13] : memref<35xf32, #tpu.memory_space<smem>>
    %68 = vector.broadcast %67 : f32 to vector<8x128xf32>
    %69 = arith.mulf %68, %66 : vector<8x128xf32>
    %70 = arith.addf %65, %69 : vector<8x128xf32>
    %71 = arith.mulf %7, %7 : vector<8x128xf32>
    %c14 = arith.constant 14 : index
    %72 = memref.load %arg2[%c14] : memref<35xf32, #tpu.memory_space<smem>>
    %73 = vector.broadcast %72 : f32 to vector<8x128xf32>
    %74 = arith.mulf %73, %71 : vector<8x128xf32>
    %75 = arith.addf %70, %74 : vector<8x128xf32>
    %76 = arith.mulf %26, %1 : vector<8x128xf32>
    %c15 = arith.constant 15 : index
    %77 = memref.load %arg2[%c15] : memref<35xf32, #tpu.memory_space<smem>>
    %78 = vector.broadcast %77 : f32 to vector<8x128xf32>
    %79 = arith.mulf %78, %76 : vector<8x128xf32>
    %80 = arith.addf %75, %79 : vector<8x128xf32>
    %81 = arith.mulf %26, %3 : vector<8x128xf32>
    %c16 = arith.constant 16 : index
    %82 = memref.load %arg2[%c16] : memref<35xf32, #tpu.memory_space<smem>>
    %83 = vector.broadcast %82 : f32 to vector<8x128xf32>
    %84 = arith.mulf %83, %81 : vector<8x128xf32>
    %85 = arith.addf %80, %84 : vector<8x128xf32>
    %86 = arith.mulf %26, %5 : vector<8x128xf32>
    %c17 = arith.constant 17 : index
    %87 = memref.load %arg2[%c17] : memref<35xf32, #tpu.memory_space<smem>>
    %88 = vector.broadcast %87 : f32 to vector<8x128xf32>
    %89 = arith.mulf %88, %86 : vector<8x128xf32>
    %90 = arith.addf %85, %89 : vector<8x128xf32>
    %91 = arith.mulf %26, %7 : vector<8x128xf32>
    %c18 = arith.constant 18 : index
    %92 = memref.load %arg2[%c18] : memref<35xf32, #tpu.memory_space<smem>>
    %93 = vector.broadcast %92 : f32 to vector<8x128xf32>
    %94 = arith.mulf %93, %91 : vector<8x128xf32>
    %95 = arith.addf %90, %94 : vector<8x128xf32>
    %96 = arith.mulf %31, %3 : vector<8x128xf32>
    %c19 = arith.constant 19 : index
    %97 = memref.load %arg2[%c19] : memref<35xf32, #tpu.memory_space<smem>>
    %98 = vector.broadcast %97 : f32 to vector<8x128xf32>
    %99 = arith.mulf %98, %96 : vector<8x128xf32>
    %100 = arith.addf %95, %99 : vector<8x128xf32>
    %101 = arith.mulf %31, %5 : vector<8x128xf32>
    %c20 = arith.constant 20 : index
    %102 = memref.load %arg2[%c20] : memref<35xf32, #tpu.memory_space<smem>>
    %103 = vector.broadcast %102 : f32 to vector<8x128xf32>
    %104 = arith.mulf %103, %101 : vector<8x128xf32>
    %105 = arith.addf %100, %104 : vector<8x128xf32>
    %106 = arith.mulf %31, %7 : vector<8x128xf32>
    %c21 = arith.constant 21 : index
    %107 = memref.load %arg2[%c21] : memref<35xf32, #tpu.memory_space<smem>>
    %108 = vector.broadcast %107 : f32 to vector<8x128xf32>
    %109 = arith.mulf %108, %106 : vector<8x128xf32>
    %110 = arith.addf %105, %109 : vector<8x128xf32>
    %111 = arith.mulf %36, %5 : vector<8x128xf32>
    %c22 = arith.constant 22 : index
    %112 = memref.load %arg2[%c22] : memref<35xf32, #tpu.memory_space<smem>>
    %113 = vector.broadcast %112 : f32 to vector<8x128xf32>
    %114 = arith.mulf %113, %111 : vector<8x128xf32>
    %115 = arith.addf %110, %114 : vector<8x128xf32>
    %116 = arith.mulf %36, %7 : vector<8x128xf32>
    %c23 = arith.constant 23 : index
    %117 = memref.load %arg2[%c23] : memref<35xf32, #tpu.memory_space<smem>>
    %118 = vector.broadcast %117 : f32 to vector<8x128xf32>
    %119 = arith.mulf %118, %116 : vector<8x128xf32>
    %120 = arith.addf %115, %119 : vector<8x128xf32>
    %121 = arith.mulf %41, %7 : vector<8x128xf32>
    %c24 = arith.constant 24 : index
    %122 = memref.load %arg2[%c24] : memref<35xf32, #tpu.memory_space<smem>>
    %123 = vector.broadcast %122 : f32 to vector<8x128xf32>
    %124 = arith.mulf %123, %121 : vector<8x128xf32>
    %125 = arith.addf %120, %124 : vector<8x128xf32>
    %126 = arith.mulf %46, %3 : vector<8x128xf32>
    %c25 = arith.constant 25 : index
    %127 = memref.load %arg2[%c25] : memref<35xf32, #tpu.memory_space<smem>>
    %128 = vector.broadcast %127 : f32 to vector<8x128xf32>
    %129 = arith.mulf %128, %126 : vector<8x128xf32>
    %130 = arith.addf %125, %129 : vector<8x128xf32>
    %131 = arith.mulf %46, %5 : vector<8x128xf32>
    %c26 = arith.constant 26 : index
    %132 = memref.load %arg2[%c26] : memref<35xf32, #tpu.memory_space<smem>>
    %133 = vector.broadcast %132 : f32 to vector<8x128xf32>
    %134 = arith.mulf %133, %131 : vector<8x128xf32>
    %135 = arith.addf %130, %134 : vector<8x128xf32>
    %136 = arith.mulf %46, %7 : vector<8x128xf32>
    %c27 = arith.constant 27 : index
    %137 = memref.load %arg2[%c27] : memref<35xf32, #tpu.memory_space<smem>>
    %138 = vector.broadcast %137 : f32 to vector<8x128xf32>
    %139 = arith.mulf %138, %136 : vector<8x128xf32>
    %140 = arith.addf %135, %139 : vector<8x128xf32>
    %141 = arith.mulf %51, %5 : vector<8x128xf32>
    %c28 = arith.constant 28 : index
    %142 = memref.load %arg2[%c28] : memref<35xf32, #tpu.memory_space<smem>>
    %143 = vector.broadcast %142 : f32 to vector<8x128xf32>
    %144 = arith.mulf %143, %141 : vector<8x128xf32>
    %145 = arith.addf %140, %144 : vector<8x128xf32>
    %146 = arith.mulf %51, %7 : vector<8x128xf32>
    %c29 = arith.constant 29 : index
    %147 = memref.load %arg2[%c29] : memref<35xf32, #tpu.memory_space<smem>>
    %148 = vector.broadcast %147 : f32 to vector<8x128xf32>
    %149 = arith.mulf %148, %146 : vector<8x128xf32>
    %150 = arith.addf %145, %149 : vector<8x128xf32>
    %151 = arith.mulf %56, %7 : vector<8x128xf32>
    %c30 = arith.constant 30 : index
    %152 = memref.load %arg2[%c30] : memref<35xf32, #tpu.memory_space<smem>>
    %153 = vector.broadcast %152 : f32 to vector<8x128xf32>
    %154 = arith.mulf %153, %151 : vector<8x128xf32>
    %155 = arith.addf %150, %154 : vector<8x128xf32>
    %156 = arith.mulf %61, %5 : vector<8x128xf32>
    %c31 = arith.constant 31 : index
    %157 = memref.load %arg2[%c31] : memref<35xf32, #tpu.memory_space<smem>>
    %158 = vector.broadcast %157 : f32 to vector<8x128xf32>
    %159 = arith.mulf %158, %156 : vector<8x128xf32>
    %160 = arith.addf %155, %159 : vector<8x128xf32>
    %161 = arith.mulf %61, %7 : vector<8x128xf32>
    %c32 = arith.constant 32 : index
    %162 = memref.load %arg2[%c32] : memref<35xf32, #tpu.memory_space<smem>>
    %163 = vector.broadcast %162 : f32 to vector<8x128xf32>
    %164 = arith.mulf %163, %161 : vector<8x128xf32>
    %165 = arith.addf %160, %164 : vector<8x128xf32>
    %166 = arith.mulf %66, %7 : vector<8x128xf32>
    %c33 = arith.constant 33 : index
    %167 = memref.load %arg2[%c33] : memref<35xf32, #tpu.memory_space<smem>>
    %168 = vector.broadcast %167 : f32 to vector<8x128xf32>
    %169 = arith.mulf %168, %166 : vector<8x128xf32>
    %170 = arith.addf %165, %169 : vector<8x128xf32>
    %171 = arith.mulf %71, %7 : vector<8x128xf32>
    %c34 = arith.constant 34 : index
    %172 = memref.load %arg2[%c34] : memref<35xf32, #tpu.memory_space<smem>>
    %173 = vector.broadcast %172 : f32 to vector<8x128xf32>
    %174 = arith.mulf %173, %171 : vector<8x128xf32>
    %175 = arith.addf %170, %174 : vector<8x128xf32>
    %176 = arith.negf %175 : vector<8x128xf32>
    %177 = math.exp %176 : vector<8x128xf32>
    %cst = arith.constant 1.000000e+00 : f32
    %178 = vector.broadcast %cst : f32 to vector<8x128xf32>
    %179 = arith.addf %178, %177 : vector<8x128xf32>
    %180 = arith.divf %178, %179 : vector<8x128xf32>
    %c0_12 = arith.constant 0 : index
    %c0_13 = arith.constant 0 : index
    %181 = vector.load %arg3[%c0_12, %c0_13] : memref<8x128xf32, #tpu.memory_space<vmem>>, vector<8x128xf32>
    tpu.vector_store %arg3[%c0_12, %c0_13], %180 {strides = array<i32>} : memref<8x128xf32, #tpu.memory_space<vmem>>, vector<8x128xf32>,
    return
  }
  func.func @transform_0(%arg0: i32) -> (i32, i32, i32) {
    %c0_i32 = arith.constant 0 : i32
    %c0_i32_0 = arith.constant 0 : i32
    %c0_i32_1 = arith.constant 0 : i32
    return %c0_i32, %arg0, %c0_i32_0 : i32, i32, i32
  }
  func.func @transform_1(%arg0: i32) -> i32 {
    %c0_i32 = arith.constant 0 : i32
    %c0_i32_0 = arith.constant 0 : i32
    return %c0_i32 : i32
  }
  func.func @transform_2(%arg0: i32) -> (i32, i32) {
    %c0_i32 = arith.constant 0 : i32
    %c0_i32_0 = arith.constant 0 : i32
    return %arg0, %c0_i32 : i32, i32
  }
}

</mosaic_0001>

<bundles_post_ra>
// kernel: tpu_custom_call.1
= control target key start
LH: loop header
LB: loop body
LE: loop exit
PB: predicated region body
PF: predicated region fallthrough
CT: control target
= control target key end

     0   :  { %7 = vsyncpa [#allocation3], 0  ;;  %s495_s0 = inlined_call_operand.hbm [shape: f32[4,8,128], index: 0, kind: input, shape index: {}]   ;;  %s496_s1 = inlined_call_operand.hbm [shape: f32[35], index: 1, kind: input, shape index: {}]   ;;  %s497_s2 = inlined_call_operand.hbm [shape: f32[8,128], index: 2, kind: output, shape index: {}]  }
   0x1   :  { %8 = vsyncpa [#allocation5], 0 }
   0x2   :  { %9 = vsyncpa [#allocation4], 0  ;;  %s14_s11 = sshll.u32 %s495_s0, 4  ;;  %s364_s12 = smov [#allocation2]   ;;  %s15_s11 = int_to_ptr.hbm [resolvable:$true] %s14_s11 }
   0x3   :  { %s16_s13 = sshll.u32 %s364_s12, 4  ;;  %s28_s16 = sshll.u32 %s496_s1, 4  ;;  %s17_s13 = int_to_ptr.vmem [resolvable:$true] %s16_s13  ;;  %s29_s16 = int_to_ptr.hbm [resolvable:$true] %s28_s16 }
   0x4   :  { %s365_s17 = smov 128   ;;  %s366_s18 = smov 8  }
   0x5   :  { %22 = dma.hbm_to_vmem [thread:$0]  %s15_s11, 512, %s17_s13, [#allocation3], %s365_s17, %s365_s17, %s366_s18  }
   0x6   :  { %s367_s19 = smov [#allocation6]  }
   0x7   :  { %31 = dma.hbm_to_smem %s29_s16, 16, %s367_s19, [#allocation5]  }
   0x8   :  { %358 = dma.done.wait [#allocation3], 512  }
   0x9   :  { %359 = vsyncadd [#allocation3], 4294966784 }
   0xa   :  { %360 = dma.done.wait [#allocation5], 16  }
   0xb   :  { %361 = vsyncadd [#allocation5], 4294967280 }
   0xc   :  { %40 = sfence }
   0xd   :  { %s48_s0 = sld [smem:[#allocation6]]  ;;  %v390_v0 = vld [vmem:[#allocation2] sm:$0xff]  ;;  %v392_v1 = vld [vmem:[#allocation2 + $0x8] sm:$0xff]  ;;  %v394_v2 = vld [vmem:[#allocation2 + $0x10] sm:$0xff] }
   0xe   :  { %s254_s20 = sld [smem:[#allocation6 + $0x1]]  ;;  %v397_v7 = vld [vmem:[#allocation2 + $0x18] sm:$0xff]  ;;  %v403_v13 = vmul.f32 %v390_v0, %v390_v0  ;;  %v408_v17 = vmul.f32 %v392_v1, %v390_v0  ;;  %v413_v21 = vmul.f32 %v394_v2, %v390_v0  ;;  %v423_v29 = vmul.f32 %v392_v1, %v392_v1 }
   0xf   :  { %s255_s21 = sld [smem:[#allocation6 + $0x2]]  ;;  %v418_v25 = vmul.f32 %v397_v7, %v390_v0  ;;  %v428_v33 = vmul.f32 %v394_v2, %v392_v1  ;;  %v433_v37 = vmul.f32 %v397_v7, %v392_v1  ;;  %v438_v41 = vmul.f32 %v394_v2, %v394_v2 }
  0x10   :  { %s256_s22 = sld [smem:[#allocation6 + $0x3]]  ;;  %v443_v45 = vmul.f32 %v397_v7, %v394_v2  ;;  %v448_v49 = vmul.f32 %v397_v7, %v397_v7  ;;  %v116_v53 = vmul.f32 %v403_v13, %v390_v0  ;;  %v121_v57 = vmul.f32 %v403_v13, %v392_v1 }
  0x11   :  { %s257_s23 = sld [smem:[#allocation6 + $0x4]]  ;;  %v126_v61 = vmul.f32 %v403_v13, %v394_v2 }
  0x12   :  { %s258_s24 = sld [smem:[#allocation6 + $0x5]] }
  0x13   :  { %s259_s1 = sld [smem:[#allocation6 + $0x6]]  ;;  %v49_v3 = vstv %s48_s0 }
  0x14   :  { %v51_v4 = vstv %s254_s20  ;;  %s260_s25 = sld [smem:[#allocation6 + $0x7]] }
  0x15   :  { %v52_v5 = vmul.f32 %v51_v4, %v390_v0  ;;  %v55_v6 = vstv %s255_s21  ;;  %s261_s26 = sld [smem:[#allocation6 + $0x8]]  ;;  %v131_v0 = vmul.f32 %v403_v13, %v397_v7 }
  0x16   :  { %v56_v8 = vmul.f32 %v55_v6, %v392_v1  ;;  %v59_v9 = vstv %s256_s22  ;;  %s262_s27 = sld [smem:[#allocation6 + $0x9]] }
  0x17   :  { %v53_v10 = vadd.f32 %v52_v5, %v49_v3  ;;  %v60_v11 = vmul.f32 %v59_v9, %v394_v2  ;;  %v63_v12 = vstv %s257_s23  ;;  %s263_s28 = sld [smem:[#allocation6 + $0xa]] }
  0x18   :  { %v68_v14 = vstv %s258_s24  ;;  %v64_v16 = vmul.f32 %v63_v12, %v397_v7  ;;  %s264_s29 = sld [smem:[#allocation6 + $0xb]]  ;;  %v141_v12 = vmul.f32 %v408_v17, %v394_v2  ;;  %s368_s24 = smov [#allocation7]  }
  0x19   :  { %v57_v15 = vadd.f32 %v56_v8, %v53_v10  ;;  %v73_v18 = vstv %s259_s1  ;;  %v69_v20 = vmul.f32 %v68_v14, %v403_v13  ;;  %s265_s30 = sld [smem:[#allocation6 + $0xc]]  ;;  %v136_v8 = vmul.f32 %v408_v17, %v392_v1  ;;  %s241_s1 = sshll.u32 %s368_s24, 4  ;;  %s242_s1 = int_to_ptr.vmem [resolvable:$true] %s241_s1 }
  0x1a   :  { %v78_v22 = vstv %s260_s25  ;;  %v74_v24 = vmul.f32 %v73_v18, %v408_v17  ;;  %s266_s3 = sld [smem:[#allocation6 + $0xd]]  ;;  %v146_v13 = vmul.f32 %v408_v17, %v397_v7  ;;  %v161_v17 = vmul.f32 %v418_v25, %v397_v7 }
  0x1b   :  { %v61_v19 = vadd.f32 %v60_v11, %v57_v15  ;;  %v83_v26 = vstv %s261_s26  ;;  %v79_v28 = vmul.f32 %v78_v22, %v413_v21  ;;  %s267_s4 = sld [smem:[#allocation6 + $0xe]]  ;;  %v151_v22 = vmul.f32 %v413_v21, %v394_v2 }
  0x1c   :  { %v88_v30 = vstv %s262_s27  ;;  %v84_v32 = vmul.f32 %v83_v26, %v418_v25  ;;  %s268_s5 = sld [smem:[#allocation6 + $0xf]]  ;;  %v176_v25 = vmul.f32 %v423_v29, %v397_v7  ;;  %s243_s27 = sshll.u32 %s497_s2, 4  ;;  %s244_s27 = int_to_ptr.hbm [resolvable:$true] %s243_s27 }
  0x1d   :  { %v65_v23 = vadd.f32 %v64_v16, %v61_v19  ;;  %v93_v34 = vstv %s263_s28  ;;  %v89_v36 = vmul.f32 %v88_v30, %v423_v29  ;;  %s269_s6 = sld [smem:[#allocation6 + $0x10]] }
  0x1e   :  { %v98_v38 = vstv %s264_s29  ;;  %v94_v40 = vmul.f32 %v93_v34, %v428_v33  ;;  %s270_s7 = sld [smem:[#allocation6 + $0x11]] }
  0x1f   :  { %v70_v27 = vadd.f32 %v69_v20, %v65_v23  ;;  %v103_v42 = vstv %s265_s30  ;;  %v99_v44 = vmul.f32 %v98_v38, %v433_v37  ;;  %s271_s8 = sld [smem:[#allocation6 + $0x12]] }
  0x20   :  { %v108_v46 = vstv %s266_s3  ;;  %v104_v48 = vmul.f32 %v103_v42, %v438_v41  ;;  %s272_s9 = sld [smem:[#allocation6 + $0x13]] }
  0x21   :  { %v75_v31 = vadd.f32 %v74_v24, %v70_v27  ;;  %v113_v50 = vstv %s267_s4  ;;  %v109_v52 = vmul.f32 %v108_v46, %v443_v45  ;;  %s273_s10 = sld [smem:[#allocation6 + $0x14]]  ;;  %v156_v27 = vmul.f32 %v413_v21, %v397_v7 }
  0x22   :  { %v118_v54 = vstv %s268_s5  ;;  %v114_v56 = vmul.f32 %v113_v50, %v448_v49  ;;  %s274_s11 = sld [smem:[#allocation6 + $0x15]]  ;;  %v171_v21 = vmul.f32 %v423_v29, %v394_v2 }
  0x23   :  { %v80_v35 = vadd.f32 %v79_v28, %v75_v31  ;;  %v123_v58 = vstv %s269_s6  ;;  %v119_v60 = vmul.f32 %v118_v54, %v116_v53  ;;  %s275_s12 = sld [smem:[#allocation6 + $0x16]]  ;;  %v186_v53 = vmul.f32 %v428_v33, %v397_v7 }
  0x24   :  { %v128_v62 = vstv %s270_s7  ;;  %v124_v3 = vmul.f32 %v123_v58, %v121_v57  ;;  %s276_s13 = sld [smem:[#allocation6 + $0x17]] }
  0x25   :  { %v85_v39 = vadd.f32 %v84_v32, %v80_v35  ;;  %v133_v4 = vstv %s271_s8  ;;  %v129_v6 = vmul.f32 %v128_v62, %v126_v61  ;;  %s277_s14 = sld [smem:[#allocation6 + $0x18]] }
  0x26   :  { %v138_v9 = vstv %s272_s9  ;;  %v134_v11 = vmul.f32 %v133_v4, %v131_v0  ;;  %s278_s15 = sld [smem:[#allocation6 + $0x19]] }
  0x27   :  { %v90_v43 = vadd.f32 %v89_v36, %v85_v39  ;;  %v143_v14 = vstv %s273_s10  ;;  %v139_v16 = vmul.f32 %v138_v9, %v136_v8  ;;  %s279_s16 = sld [smem:[#allocation6 + $0x1a]]  ;;  %v166_v36 = vmul.f32 %v423_v29, %v392_v1 }
  0x28   :  { %v148_v18 = vstv %s274_s11  ;;  %v144_v20 = vmul.f32 %v143_v14, %v141_v12  ;;  %s280_s17 = sld [smem:[#allocation6 + $0x1b]]  ;;  %v181_v1 = vmul.f32 %v428_v33, %v394_v2  ;;  %v191_v29 = vmul.f32 %v433_v37, %v397_v7 }
  0x29   :  { %v95_v47 = vadd.f32 %v94_v40, %v90_v43  ;;  %v153_v23 = vstv %s275_s12  ;;  %v149_v26 = vmul.f32 %v148_v18, %v146_v13  ;;  %s281_s18 = sld [smem:[#allocation6 + $0x1c]]  ;;  %v201_v33 = vmul.f32 %v438_v41, %v397_v7 }
  0x2a   :  { %v158_v28 = vstv %s276_s13  ;;  %v154_v31 = vmul.f32 %v153_v23, %v151_v22  ;;  %s282_s19 = sld [smem:[#allocation6 + $0x1d]]  ;;  %v211_v9 = vmul.f32 %v448_v49, %v397_v7 }
  0x2b   :  { %v100_v51 = vadd.f32 %v99_v44, %v95_v47  ;;  %v163_v32 = vstv %s277_s14  ;;  %v159_v35 = vmul.f32 %v158_v28, %v156_v27  ;;  %s283_s0 = sld [smem:[#allocation6 + $0x1e]] }
  0x2c   :  { %v168_v38 = vstv %s278_s15  ;;  %v164_v40 = vmul.f32 %v163_v32, %v161_v17  ;;  %s284_s20 = sld [smem:[#allocation6 + $0x1f]] }
  0x2d   :  { %v105_v55 = vadd.f32 %v104_v48, %v100_v51  ;;  %v173_v42 = vstv %s279_s16  ;;  %v169_v44 = vmul.f32 %v168_v38, %v166_v36  ;;  %s285_s21 = sld [smem:[#allocation6 + $0x20]] }
  0x2e   :  { %v178_v46 = vstv %s280_s17  ;;  %v174_v48 = vmul.f32 %v173_v42, %v171_v21  ;;  %s286_s22 = sld [smem:[#allocation6 + $0x21]] }
  0x2f   :  { %v110_v59 = vadd.f32 %v109_v52, %v105_v55  ;;  %v183_v50 = vstv %s281_s18  ;;  %v179_v52 = vmul.f32 %v178_v46, %v176_v25  ;;  %s287_s23 = sld [smem:[#allocation6 + $0x22]] }
  0x30   :  { %v188_v54 = vstv %s282_s19 }
  0x31   :  { %v115_v63 = vadd.f32 %v114_v56, %v110_v59  ;;  %v184_v56 = vmul.f32 %v183_v50, %v181_v1  ;;  %v193_v57 = vstv %s283_s0  ;;  %v189_v59 = vmul.f32 %v188_v54, %v186_v53 }
  0x32   :  { %v198_v61 = vstv %s284_s20 }
  0x33   :  { %v120_v5 = vadd.f32 %v119_v60, %v115_v63  ;;  %v196_v60 = vmul.f32 %v438_v41, %v394_v2  ;;  %v194_v63 = vmul.f32 %v193_v57, %v191_v29 }
  0x34   :  { %v208_v37 = vstv %s286_s22 }
  0x35   :  { %v125_v10 = vadd.f32 %v124_v3, %v120_v5  ;;  %v203_v3 = vstv %s285_s21  ;;  %v199_v4 = vmul.f32 %v198_v61, %v196_v60  ;;  %v206_v5 = vmul.f32 %v443_v45, %v397_v7 }
  0x36   :  { %v204_v8 = vmul.f32 %v203_v3, %v201_v33 }
  0x37   :  { %v130_v15 = vadd.f32 %v129_v6, %v125_v10  ;;  %v213_v10 = vstv %s287_s23 }
  0x38   :  { %v214_v14 = vmul.f32 %v213_v10, %v211_v9 }
  0x39   :  { %v135_v19 = vadd.f32 %v134_v11, %v130_v15  ;;  %v209_v11 = vmul.f32 %v208_v37, %v206_v5 }
  0x3b   :  { %v140_v24 = vadd.f32 %v139_v16, %v135_v19 }
  0x3d   :  { %v145_v30 = vadd.f32 %v144_v20, %v140_v24 }
  0x3f   :  { %v150_v34 = vadd.f32 %v149_v26, %v145_v30 }
  0x41   :  { %v155_v39 = vadd.f32 %v154_v31, %v150_v34 }
  0x43   :  { %v160_v43 = vadd.f32 %v159_v35, %v155_v39 }
  0x45   :  { %v165_v47 = vadd.f32 %v164_v40, %v160_v43 }
  0x47   :  { %v170_v51 = vadd.f32 %v169_v44, %v165_v47 }
  0x49   :  { %v175_v55 = vadd.f32 %v174_v48, %v170_v51 }
  0x4b   :  { %v180_v58 = vadd.f32 %v179_v52, %v175_v55 }
  0x4d   :  { %v185_v62 = vadd.f32 %v184_v56, %v180_v58 }
  0x4f   :  { %v190_v0 = vadd.f32 %v189_v59, %v185_v62 }
  0x51   :  { %v195_v6 = vadd.f32 %v194_v63, %v190_v0 }
  0x53   :  { %v200_v2 = vadd.f32 %v199_v4, %v195_v6 }
  0x55   :  { %v205_v12 = vadd.f32 %v204_v8, %v200_v2 }
  0x57   :  { %v210_v15 = vadd.f32 %v209_v11, %v205_v12 }
  0x59   :  { %v215_v16 = vadd.f32 %v214_v14, %v210_v15 }
  0x5b   :  { %v288_v41 = vmul.f32 -1.442695, %v215_v16 }
  0x5d   :  { %294 = vpow2.f32 %v288_v41 }
  0x63   :  { %v295_v13 = vpop.eup %294 }
  0x64   :  { %v219_v18 = vadd.f32 1.0, %v295_v13 }
  0x66   :  { %296 = vrcp.f32 %v219_v18  ;;  %v231_v20 = vand.u32 2147483648, %v219_v18  ;;  %vm225_vm0 = vweird.f32 %v219_v18  ;;  %v229_v23 = vand.u32 2147483647, %v219_v18 }
  0x68   :  { %v232_v49 = vor.u32 1.1754944e-38, %v231_v20  ;;  %vm230_vm3 = vcmp.eq.f32.partialorder %v229_v23, 8.507059e+37 }
  0x6c   :  { %v297_v19 = vpop.eup %296 }
  0x6d   :  { %v221_v45 = vmul.f32 %v297_v19, %v219_v18  ;;  %vm226_vm1 = vweird.f32 %v297_v19 }
  0x6e   :  { %vm227_vm2 = vmor %vm225_vm0, %vm226_vm1 }
  0x6f   :  { %v222_v22 = vsub.f32 1.0, %v221_v45 }
  0x71   :  { %v223_v7 = vmul.f32 %v297_v19, %v222_v22 }
  0x73   :  { %v224_v24 = vadd.f32 %v297_v19, %v223_v7 }
  0x75   :  { %v228_v26 = vsel %vm227_vm2, %v297_v19, %v224_v24 }
  0x76   :  { %v233_v27 = vsel %vm230_vm3, %v232_v49, %v228_v26 }
  0x77   :  { %235 = vst [vmem:[#allocation7] sm:$0xff] %v233_v27 }
  0x78   :  { %246 = dma.vmem_to_hbm [thread:$0]  %s242_s1, 128, %s244_s27, [#allocation4]  }
  0x79   :  { %362 = dma.done.wait [#allocation4], 128  }
  0x7a   :  { %363 = vsyncadd [#allocation4], 4294967168 }
  0x7b   :  { %251 = vsyncpa [#allocation3], 1 }
  0x7c   :  { %252 = vsyncpa [#allocation4], 1 }
  0x7d   :  { %253 = vsyncpa [#allocation5], 1 }

</bundles_post_ra>
